<compile_context>
chip_gen: v7x
topology: tpu7x:2x2x1
jax: 0.10.0
libtpu: 0.0.40
codegen_flags: <defaults>
</compile_context>

<pallas_src>
import functools
import math

import jax
import jax.numpy as jnp
from jax.experimental import pallas as pl
from jax.experimental.pallas import tpu as pltpu

_LANES = 128
# Candidate slab widths (last dim), widest first: lane-dense unmasked stores.
_WIDTH_CANDIDATES = (4096, 2048, 1024, 512, 256, 128)


def _chip_kind() -> str:
    try:
        return jax.devices()[0].device_kind.lower()
    except Exception:  # pragma: no cover - CPU/interpret fallback
        return ""


def _is_v7x() -> bool:
    # v7x has 2 TensorCores, 3.2 TB/s HBM per TC and 64 MiB VMEM per TC.
    return "7" in _chip_kind()


def _sublane_multiple(dtype) -> int:
    # Packed-tile minimum rows: (8,128) f32, (16,128) bf16/f16, (32,128) int8/fp8.
    itemsize = jnp.dtype(dtype).itemsize
    return max(8, 32 // max(1, itemsize))


def _activation_kernel(x_ref, o_ref, *, name: str, approx_recip: bool):
    xf = x_ref[...].astype(jnp.float32)
    if name == "mish":
        # mish(x) = x * tanh(softplus(x)); with e = exp(x):
        #   tanh(log1p(e)) = (e*e + 2e) / (e*e + 2e + 2)
        e = jnp.exp(jnp.minimum(xf, 20.0))
        t = e * e + 2.0 * e
        d = t + 2.0
        if approx_recip:
            # EUP fast reciprocal + one Newton step on the VPU (slack unit).
            r = pl.reciprocal(d, approx=True)
            r = r * (2.0 - d * r)
            frac = 1.0 - 2.0 * r            # == t / (t + 2)
        else:
            frac = t / d
        y = jnp.where(xf > 20.0, xf, xf * frac)
    elif name == "swish":
        y = xf * jax.nn.sigmoid(xf)
    elif name == "relu":
        y = jnp.maximum(xf, 0.0)
    else:
        raise ValueError(f"unknown activation: {name}")
    o_ref[...] = y.astype(o_ref.dtype)


def _activation_jnp(x: jnp.ndarray, name: str) -> jnp.ndarray:
    """Exact (reference / tiny-tail) formulation, computed in f32."""
    xf = x.astype(jnp.float32)
    if name == "mish":
        y = xf * jnp.tanh(jax.nn.softplus(xf))
    elif name == "swish":
        y = xf * jax.nn.sigmoid(xf)
    elif name == "relu":
        y = jnp.maximum(xf, 0.0)
    else:
        raise ValueError(f"unknown activation: {name}")
    return y.astype(x.dtype)


def _run_slab(slab, name, *, block_rows, width, vmem_limit, approx_recip, donate):
    rows = slab.shape[0]
    grid = (pl.cdiv(rows, block_rows),)  # ragged last row-block is masked by Pallas
    kernel = functools.partial(_activation_kernel, name=name, approx_recip=approx_recip)
    extra = {}
    if donate:
        # Same shape & dtype in/out: callers that donate x avoid a second
        # full-size HBM allocation.
        extra["input_output_aliases"] = {0: 0}
    return pl.pallas_call(
        kernel,
        out_shape=jax.ShapeDtypeStruct(slab.shape, slab.dtype),
        grid_spec=pltpu.PrefetchScalarGridSpec(
            num_scalar_prefetch=0,
            grid=grid,
            in_specs=[pl.BlockSpec((block_rows, width), lambda i: (i, 0))],
            out_specs=pl.BlockSpec((block_rows, width), lambda i: (i, 0)),
        ),
        compiler_params=pltpu.CompilerParams(
            # Shards the grid across both TensorCores on v7x; no-op on 1-TC chips.
            dimension_semantics=("parallel",),
            vmem_limit_bytes=vmem_limit,
        ),
        **extra,
    )(slab)


def activation_lambda(x: jnp.ndarray, name: str = "mish", *,
                      donate_input: bool = False) -> jnp.ndarray:
    """Pallas equivalent of _ActivationLambda.forward for the given activation."""
    orig_shape = x.shape
    orig_dtype = x.dtype
    n = int(math.prod(orig_shape)) if orig_shape else 1
    flat = x.reshape(-1)

    if n < _LANES:
        # Too small for a lane-dense kernel launch; plain fused elementwise.
        return _activation_jnp(flat, name).reshape(orig_shape)

    v7x = _is_v7x()
    itemsize = jnp.dtype(orig_dtype).itemsize
    sub = _sublane_multiple(orig_dtype)
    # ~2 MiB per block on v5e/v6e (past the overhead knee); ~4 MiB on v7x where
    # 3.2 TB/s makes the ~0.35 us per-step overhead proportionally costlier.
    target_block_bytes = (4 << 20) if v7x else (2 << 20)

    # Widest lane-dense width that divides n exactly (no tail at all); otherwise
    # widest width <= n, with the < width tail handled by a tiny jnp epilogue.
    width = None
    for w in _WIDTH_CANDIDATES:
        if n % w == 0:
            width = w
            break
    if width is None:
        for w in _WIDTH_CANDIDATES:
            if n >= w:
                width = w
                break
    n_aligned = (n // width) * width
    tail_len = n - n_aligned

    prefix = flat if tail_len == 0 else flat[:n_aligned]
    slab = prefix.reshape(-1, width)
    rows = slab.shape[0]

    # Row-block sized by bytes (dtype-aware); rounded to the packed-tile minimum
    # unless it spans the full row extent (always legal).
    block_rows = max(1, target_block_bytes // (width * itemsize))
    if block_rows >= rows:
        block_rows = rows
    else:
        block_rows = max(sub, (block_rows // sub) * sub)

    block_bytes = block_rows * width * itemsize
    # Double-buffered in + out (4x block) plus headroom for in-kernel f32 temps.
    vmem_limit = int(4 * block_bytes + (8 << 20))

    out_slab = _run_slab(
        slab, name,
        block_rows=block_rows, width=width, vmem_limit=vmem_limit,
        approx_recip=(v7x and name == "mish"),
        donate=(donate_input and tail_len == 0),
    )

    out_flat = out_slab.reshape(-1)
    if tail_len:
        # Tiny (< width elements) tail: plain jnp, stitched with one concatenate.
        tail_out = _activation_jnp(flat[n_aligned:], name)
        out_flat = jnp.concatenate([out_flat, tail_out])
    return out_flat.reshape(orig_shape)


# Reference (matches torch mish/swish/relu semantics, computed in f32).
_reference = _activation_jnp


if __name__ == "__main__":
    key = jax.random.PRNGKey(0)

    # NCHW input, consistent with PyTorch conv-activation usage.
    x = jax.random.normal(key, (2, 4, 16, 16), dtype=jnp.float32)

    out = jax.block_until_ready(activation_lambda(x, name="mish"))
    ref = _reference(x, "mish")
    assert out.shape == x.shape and out.dtype == x.dtype
    assert jnp.allclose(out, ref, atol=1e-5, rtol=1e-5), "mish mismatch vs reference"

    # Swish path (lambda-style configurability).
    out_sw = jax.block_until_ready(activation_lambda(x, name="swish"))
    assert jnp.allclose(out_sw, _reference(x, "swish"), atol=1e-5, rtol=1e-5)

    # bf16 input exercises the dtype-aware (16,128) sublane handling.
    x_bf16 = x.astype(jnp.bfloat16)
    out_bf = jax.block_until_ready(activation_lambda(x_bf16, name="mish"))
    assert out_bf.dtype == jnp.bfloat16
    assert jnp.allclose(out_bf.astype(jnp.float32),
                        _reference(x_bf16, "mish").astype(jnp.float32),
                        atol=1e-2, rtol=1e-2)

    # Awkward (non-128-divisible) size: aligned prefix via Pallas, tiny jnp tail,
    # no jnp.pad / trailing-slice passes over the whole array.
    x_odd = jax.random.normal(jax.random.PRNGKey(1), (3, 5, 7, 11), dtype=jnp.float32)
    out_odd = jax.block_until_ready(activation_lambda(x_odd, name="mish"))
    assert jnp.allclose(out_odd, _reference(x_odd, "mish"), atol=1e-5, rtol=1e-5)

    print("KERNEL_OK")
</pallas_src>

<mosaic_0001>
module attributes {stable_mosaic.version = 11 : i64} {
  func.func @_activation_kernel(%arg0: i32, %arg1: memref<1x2048xf32, #tpu.memory_space<vmem>>, %arg2: memref<1x2048xf32, #tpu.memory_space<vmem>>) attributes {dimension_semantics = [#tpu.dimension_semantics<parallel>], iteration_bounds = array<i64: 1>, scalar_prefetch = 0 : i64, scratch_operands = 0 : i64, tpu.core_type = #tpu.core_type<tc>, window_params = [{transform_indices = @transform_0, window_bounds = array<i64: 1, 2048>}, {transform_indices = @transform_1, window_bounds = array<i64: 1, 2048>}]} {
    %c0 = arith.constant 0 : index
    %c0_0 = arith.constant 0 : index
    %0 = vector.load %arg1[%c0, %c0_0] : memref<1x2048xf32, #tpu.memory_space<vmem>>, vector<1x2048xf32>
    %cst = arith.constant 2.000000e+01 : f32
    %1 = vector.broadcast %cst : f32 to vector<1x2048xf32>
    %2 = arith.minimumf %0, %1 : vector<1x2048xf32>
    %3 = math.exp %2 : vector<1x2048xf32>
    %4 = arith.mulf %3, %3 : vector<1x2048xf32>
    %cst_1 = arith.constant 2.000000e+00 : f32
    %5 = vector.broadcast %cst_1 : f32 to vector<1x2048xf32>
    %6 = arith.mulf %5, %3 : vector<1x2048xf32>
    %7 = arith.addf %4, %6 : vector<1x2048xf32>
    %cst_2 = arith.constant 2.000000e+00 : f32
    %8 = vector.broadcast %cst_2 : f32 to vector<1x2048xf32>
    %9 = arith.addf %7, %8 : vector<1x2048xf32>
    %10 = arith.divf %7, %9 : vector<1x2048xf32>
    %cst_3 = arith.constant 2.000000e+01 : f32
    %11 = vector.broadcast %cst_3 : f32 to vector<1x2048xf32>
    %12 = arith.cmpf ogt, %0, %11 : vector<1x2048xf32>
    %13 = arith.mulf %0, %10 : vector<1x2048xf32>
    %14 = arith.select %12, %0, %13 : vector<1x2048xi1>, vector<1x2048xf32>
    %c0_4 = arith.constant 0 : index
    %c0_5 = arith.constant 0 : index
    %15 = vector.load %arg2[%c0_4, %c0_5] : memref<1x2048xf32, #tpu.memory_space<vmem>>, vector<1x2048xf32>
    tpu.vector_store %arg2[%c0_4, %c0_5], %14 {strides = array<i32>} : memref<1x2048xf32, #tpu.memory_space<vmem>>, vector<1x2048xf32>,
    return
  }
  func.func @transform_0(%arg0: i32) -> (i32, i32) {
    %c0_i32 = arith.constant 0 : i32
    %c0_i32_0 = arith.constant 0 : i32
    return %arg0, %c0_i32 : i32, i32
  }
  func.func @transform_1(%arg0: i32) -> (i32, i32) {
    %c0_i32 = arith.constant 0 : i32
    %c0_i32_0 = arith.constant 0 : i32
    return %arg0, %c0_i32 : i32, i32
  }
}

</mosaic_0001>

<bundles_post_ra>
// kernel: tpu_custom_call.1
= control target key start
LH: loop header
LB: loop body
LE: loop exit
PB: predicated region body
PF: predicated region fallthrough
CT: control target
= control target key end

     0   :  { %6 = vsyncpa [#allocation3], 0  ;;  %s158_s0 = inlined_call_operand.hbm [shape: f32[1,2048], index: 0, kind: input, shape index: {}]   ;;  %s159_s1 = inlined_call_operand.hbm [shape: f32[1,2048], index: 1, kind: output, shape index: {}]  }
   0x1   :  { %7 = vsyncpa [#allocation4], 0  ;;  %s122_s6 = smov [#allocation2]   ;;  %s74_s10 = scalar_lea.hbm %s158_s0, 256 }
   0x2   :  { %s14_s7 = sshll.u32 %s122_s6, 4  ;;  %p75_p0 = scmp.ne.s32.totalorder %s158_s0, %s74_s10  ;;  %s15_s7 = int_to_ptr.vmem [resolvable:$true] %s14_s7 }
   0x3   :  { %p78_p1 = scmp.lt.u32.totalorder %s74_s10, %s158_s0 }
   0x5   :  { %p80_p2 = pnand %p78_p1, %p75_p0 }
   0x7   :  { %83 = shalt.err (!%p80_p2)
}
   0x8   :  { %s84_s15 = scalar_lea.vmem %s15_s7, 256  ;;  %p89_p4 = scmp.lt.s32.totalorder %s15_s7, %s15_s7 }
   0x9   :  { %p85_p3 = scmp.ne.s32.totalorder %s15_s7, %s84_s15  ;;  %p90_p5 = scmp.lt.s32.totalorder %s84_s15, %s84_s15 }
   0xb   :  { %p91_p6 = por %p90_p5, %p89_p4 }
   0xd   :  { %p92_p7 = pnand %p91_p6, %p85_p3 }
   0xf   :  { %95 = shalt.err (!%p92_p7)
}
  0x10   :  { %17 = dma.hbm_to_vmem [thread:$0]  %s158_s0, 256, %s15_s7, [#allocation3]  }
  0x11   :  { %118 = dma.done.wait [#allocation3], 256  }
  0x12   :  { %119 = vsyncadd [#allocation3], 4294967040  ;;  %v21_v0 = vld [vmem:[#allocation2] sm:$0xff]  ;;  %v22_v1 = vld [vmem:[#allocation2 + $0x8] sm:$0xff]  ;;  %s123_s0 = smov [#allocation5]  }
  0x13   :  { %v23_v2 = vmin.f32 %v21_v0, 20.0  ;;  %v24_v3 = vmin.f32 %v22_v1, 20.0  ;;  %vm41_vm0 = vcmp.gt.f32.partialorder %v21_v0, 20.0  ;;  %s55_s18 = sshll.u32 %s123_s0, 4  ;;  %vm42_vm1 = vcmp.gt.f32.partialorder %v22_v1, 20.0  ;;  %s56_s18 = int_to_ptr.vmem [resolvable:$true] %s55_s18 }
  0x14   :  { %s96_s19 = scalar_lea.vmem %s56_s18, 256  ;;  %p101_p9 = scmp.lt.s32.totalorder %s56_s18, %s56_s18 }
  0x15   :  { %v25_v4 = vmul.f32 1.442695, %v23_v2  ;;  %v27_v5 = vmul.f32 1.442695, %v24_v3  ;;  %p97_p8 = scmp.ne.s32.totalorder %s56_s18, %s96_s19  ;;  %p102_p10 = scmp.lt.s32.totalorder %s96_s19, %s96_s19 }
  0x17   :  { %66 = vpow2.f32 %v25_v4  ;;  %p103_p11 = por %p102_p10, %p101_p9 }
  0x18   :  { %68 = vpow2.f32 %v27_v5 }
  0x19   :  { %p104_p12 = pnand %p103_p11, %p97_p8 }
  0x21   :  { %v67_v6 = vpop.eup %66 }
  0x22   :  { %v69_v7 = vpop.eup %68  ;;  %v29_v8 = vmul.f32 %v67_v6, %v67_v6  ;;  %v31_v9 = vmul.f32 2.0, %v67_v6 }
  0x23   :  { %v30_v10 = vmul.f32 %v69_v7, %v69_v7  ;;  %v32_v11 = vmul.f32 2.0, %v69_v7 }
  0x24   :  { %v33_v12 = vadd.f32 %v31_v9, %v29_v8 }
  0x25   :  { %v34_v13 = vadd.f32 %v32_v11, %v30_v10 }
  0x26   :  { %v35_v14 = vadd.f32 2.0, %v33_v12 }
  0x27   :  { %v36_v15 = vadd.f32 2.0, %v34_v13 }
  0x28   :  { %70 = vrcp.f32 %v35_v14 }
  0x29   :  { %72 = vrcp.f32 %v36_v15 }
  0x32   :  { %v71_v16 = vpop.eup %70 }
  0x33   :  { %v73_v17 = vpop.eup %72  ;;  %v38_v18 = vmul.f32 %v71_v16, %v33_v12 }
  0x34   :  { %v40_v19 = vmul.f32 %v73_v17, %v34_v13 }
  0x35   :  { %v43_v20 = vmul.f32 %v38_v18, %v21_v0 }
  0x36   :  { %v44_v21 = vmul.f32 %v40_v19, %v22_v1 }
  0x37   :  { %v45_v22 = vsel %vm41_vm0, %v21_v0, %v43_v20 }
  0x38   :  { %47 = vst [vmem:[#allocation5] sm:$0xff] %v45_v22  ;;  %v46_v23 = vsel %vm42_vm1, %v22_v1, %v44_v21 }
  0x39   :  { %48 = vst [vmem:[#allocation5 + $0x8] sm:$0xff] %v46_v23 }
  0x3a   :  { %107 = shalt.err (!%p104_p12)
}
  0x3b   :  { %s108_s22 = scalar_lea.hbm %s159_s1, 256 }
  0x3c   :  { %p109_p13 = scmp.ne.s32.totalorder %s159_s1, %s108_s22  ;;  %p112_p0 = scmp.lt.u32.totalorder %s108_s22, %s159_s1 }
  0x3e   :  { %p114_p1 = pnand %p112_p0, %p109_p13 }
  0x40   :  { %117 = shalt.err (!%p114_p1)
}
  0x41   :  { %58 = dma.vmem_to_hbm [thread:$0]  %s56_s18, 256, %s159_s1, [#allocation4]  }
  0x42   :  { %120 = dma.done.wait [#allocation4], 256  }
  0x43   :  { %121 = vsyncadd [#allocation4], 4294967040 }
  0x44   :  { %62 = vsyncpa [#allocation3], 1 }
  0x45   :  { %63 = vsyncpa [#allocation4], 1 }

</bundles_post_ra>
